<compile_context>
chip_gen: v5e
topology: v5e:2x2
jax: 0.10.0
libtpu: 0.0.40
codegen_flags: <defaults>
</compile_context>

<pallas_src>
import jax
import jax.numpy as jnp
from jax.experimental import pallas as pl
from jax.experimental.pallas import tpu as pltpu

EPS = 1e-5


def _bn1d_kernel(x_ref, gamma_ref, beta_ref, o_ref):
    # x_ref: (N, TILE_D)   gamma_ref/beta_ref: (1, TILE_D)   o_ref: (N, TILE_D)
    x = x_ref[...].astype(jnp.float32)
    n = x.shape[0]
    inv_n = jnp.float32(1.0 / n)

    # One-pass per-channel statistics (f32 accumulation).
    s = jnp.sum(x, axis=0, keepdims=True)          # (1, TILE_D)
    sq = jnp.sum(x * x, axis=0, keepdims=True)     # (1, TILE_D)
    mean = s * inv_n
    var = jnp.maximum(sq * inv_n - mean * mean, 0.0)   # biased variance, clamped >= 0
    inv_std = jax.lax.rsqrt(var + EPS)

    # Fold affine + normalization into a single per-channel scale/shift.
    scale = gamma_ref[...] * inv_std               # (1, TILE_D)
    shift = beta_ref[...] - mean * scale           # (1, TILE_D)

    o_ref[...] = (x * scale + shift).astype(o_ref.dtype)


def _pick_tile_d(d: int) -> int:
    # Lane-dense tiling: either the full D (fine for any size, including D<128)
    # or a multiple-of-128 tile that keeps (N, TILE_D) blocks VMEM-friendly.
    if d <= 512:
        return d
    for cand in (512, 384, 256, 128):
        if d % cand == 0:
            return cand
    return 512  # partial last block handled by Pallas (per-channel stats unaffected)


def batchnorm1d(x, gamma, beta, *, tile_d=None):
    """x: (N, D) float array. gamma/beta: (D,) affine params."""
    n, d = x.shape
    if tile_d is None:
        tile_d = _pick_tile_d(d)
    grid_d = pl.cdiv(d, tile_d)

    gamma2d = gamma.reshape(1, d).astype(jnp.float32)
    beta2d = beta.reshape(1, d).astype(jnp.float32)

    return pl.pallas_call(
        _bn1d_kernel,
        out_shape=jax.ShapeDtypeStruct((n, d), x.dtype),
        grid=(grid_d,),
        in_specs=[
            pl.BlockSpec((n, tile_d), lambda j: (0, j)),
            pl.BlockSpec((1, tile_d), lambda j: (0, j)),
            pl.BlockSpec((1, tile_d), lambda j: (0, j)),
        ],
        out_specs=pl.BlockSpec((n, tile_d), lambda j: (0, j)),
        compiler_params=pltpu.CompilerParams(
            dimension_semantics=("parallel",),
        ),
    )(x, gamma2d, beta2d)


def batchnorm1d_ref(x, gamma, beta):
    x32 = x.astype(jnp.float32)
    mean = jnp.mean(x32, axis=0, keepdims=True)
    var = jnp.mean((x32 - mean) ** 2, axis=0, keepdims=True)
    y = (x32 - mean) / jnp.sqrt(var + EPS) * gamma[None, :] + beta[None, :]
    return y.astype(x.dtype)


if __name__ == "__main__":
    key = jax.random.PRNGKey(0)

    # Case 1: small shape matching the module's (-1, dim) view.
    N, D = 8, 32
    x = jax.random.normal(key, (N, D), dtype=jnp.float32)
    gamma = jnp.ones((D,), dtype=jnp.float32)   # BatchNorm2d affine init: weight=1
    beta = jnp.zeros((D,), dtype=jnp.float32)   # bias=0

    out = jax.block_until_ready(batchnorm1d(x, gamma, beta))
    ref = batchnorm1d_ref(x, gamma, beta)
    assert out.shape == (N, D)
    assert jnp.allclose(out, ref, atol=1e-5, rtol=1e-5), "mismatch vs reference (case 1)"

    # Case 2: lane-dense, multi-tile grid path (TILE_D=128, grid=(2,)).
    key2 = jax.random.PRNGKey(1)
    N2, D2 = 16, 256
    x2 = jax.random.normal(key2, (N2, D2), dtype=jnp.float32) * 2.0 + 0.5
    gamma2 = jnp.ones((D2,), dtype=jnp.float32)
    beta2 = jnp.zeros((D2,), dtype=jnp.float32)

    out2 = jax.block_until_ready(batchnorm1d(x2, gamma2, beta2, tile_d=128))
    ref2 = batchnorm1d_ref(x2, gamma2, beta2)
    assert out2.shape == (N2, D2)
    assert jnp.allclose(out2, ref2, atol=1e-5, rtol=1e-5), "mismatch vs reference (case 2)"

    print("KERNEL_OK")
</pallas_src>

<mosaic_0001>
module attributes {stable_mosaic.version = 11 : i64} {
  func.func @_bn1d_kernel(%arg0: i32, %arg1: memref<8x32xf32, #tpu.memory_space<vmem>>, %arg2: memref<1x32xf32, #tpu.memory_space<vmem>>, %arg3: memref<1x32xf32, #tpu.memory_space<vmem>>, %arg4: memref<8x32xf32, #tpu.memory_space<vmem>>) attributes {dimension_semantics = [#tpu.dimension_semantics<parallel>], iteration_bounds = array<i64: 1>, scalar_prefetch = 0 : i64, scratch_operands = 0 : i64, tpu.core_type = #tpu.core_type<tc>, window_params = [{transform_indices = @transform_0, window_bounds = array<i64: 8, 32>}, {transform_indices = @transform_1, window_bounds = array<i64: 1, 32>}, {transform_indices = @transform_2, window_bounds = array<i64: 1, 32>}, {transform_indices = @transform_3, window_bounds = array<i64: 8, 32>}]} {
    %c0 = arith.constant 0 : index
    %c0_0 = arith.constant 0 : index
    %0 = vector.load %arg1[%c0, %c0_0] : memref<8x32xf32, #tpu.memory_space<vmem>>, vector<8x32xf32>
    %cst = arith.constant dense<0.000000e+00> : vector<32xf32>
    %1 = vector.multi_reduction <add>, %0, %cst [0] : vector<8x32xf32> to vector<32xf32>
    %2 = vector.shape_cast %1 : vector<32xf32> to vector<1x32xf32>
    %3 = arith.mulf %0, %0 : vector<8x32xf32>
    %cst_1 = arith.constant dense<0.000000e+00> : vector<32xf32>
    %4 = vector.multi_reduction <add>, %3, %cst_1 [0] : vector<8x32xf32> to vector<32xf32>
    %5 = vector.shape_cast %4 : vector<32xf32> to vector<1x32xf32>
    %cst_2 = arith.constant 1.250000e-01 : f32
    %6 = vector.broadcast %cst_2 : f32 to vector<1x32xf32>
    %7 = arith.mulf %2, %6 : vector<1x32xf32>
    %cst_3 = arith.constant 1.250000e-01 : f32
    %8 = vector.broadcast %cst_3 : f32 to vector<1x32xf32>
    %9 = arith.mulf %5, %8 : vector<1x32xf32>
    %10 = arith.mulf %7, %7 : vector<1x32xf32>
    %11 = arith.subf %9, %10 : vector<1x32xf32>
    %cst_4 = arith.constant 0.000000e+00 : f32
    %12 = vector.broadcast %cst_4 : f32 to vector<1x32xf32>
    %13 = arith.maximumf %11, %12 : vector<1x32xf32>
    %cst_5 = arith.constant 9.99999974E-6 : f32
    %14 = vector.broadcast %cst_5 : f32 to vector<1x32xf32>
    %15 = arith.addf %13, %14 : vector<1x32xf32>
    %16 = math.rsqrt %15 : vector<1x32xf32>
    %c0_6 = arith.constant 0 : index
    %c0_7 = arith.constant 0 : index
    %17 = vector.load %arg2[%c0_6, %c0_7] : memref<1x32xf32, #tpu.memory_space<vmem>>, vector<1x32xf32>
    %18 = arith.mulf %17, %16 : vector<1x32xf32>
    %c0_8 = arith.constant 0 : index
    %c0_9 = arith.constant 0 : index
    %19 = vector.load %arg3[%c0_8, %c0_9] : memref<1x32xf32, #tpu.memory_space<vmem>>, vector<1x32xf32>
    %20 = arith.mulf %7, %18 : vector<1x32xf32>
    %21 = arith.subf %19, %20 : vector<1x32xf32>
    %22 = vector.broadcast %18 : vector<1x32xf32> to vector<8x32xf32>
    %23 = arith.mulf %0, %22 : vector<8x32xf32>
    %24 = vector.broadcast %21 : vector<1x32xf32> to vector<8x32xf32>
    %25 = arith.addf %23, %24 : vector<8x32xf32>
    %c0_10 = arith.constant 0 : index
    %c0_11 = arith.constant 0 : index
    %26 = vector.load %arg4[%c0_10, %c0_11] : memref<8x32xf32, #tpu.memory_space<vmem>>, vector<8x32xf32>
    tpu.vector_store %arg4[%c0_10, %c0_11], %25 {strides = array<i32>} : memref<8x32xf32, #tpu.memory_space<vmem>>, vector<8x32xf32>,
    return
  }
  func.func @transform_0(%arg0: i32) -> (i32, i32) {
    %c0_i32 = arith.constant 0 : i32
    %c0_i32_0 = arith.constant 0 : i32
    return %c0_i32, %arg0 : i32, i32
  }
  func.func @transform_1(%arg0: i32) -> (i32, i32) {
    %c0_i32 = arith.constant 0 : i32
    %c0_i32_0 = arith.constant 0 : i32
    return %c0_i32, %arg0 : i32, i32
  }
  func.func @transform_2(%arg0: i32) -> (i32, i32) {
    %c0_i32 = arith.constant 0 : i32
    %c0_i32_0 = arith.constant 0 : i32
    return %c0_i32, %arg0 : i32, i32
  }
  func.func @transform_3(%arg0: i32) -> (i32, i32) {
    %c0_i32 = arith.constant 0 : i32
    %c0_i32_0 = arith.constant 0 : i32
    return %c0_i32, %arg0 : i32, i32
  }
}

</mosaic_0001>

<bundles_post_ra>
// kernel: tpu_custom_call.1
= control target key start
LH: loop header
LB: loop body
LE: loop exit
PB: predicated region body
PF: predicated region fallthrough
CT: control target
= control target key end

     0   :  { %8 = vsyncpa [#allocation3], 0  ;;  %s229_s0 = inlined_call_operand.hbm [shape: f32[8,32], index: 0, kind: input, shape index: {}]   ;;  %s230_s1 = inlined_call_operand.hbm [shape: f32[1,32], index: 1, kind: input, shape index: {}]   ;;  %s231_s2 = inlined_call_operand.vmem [shape: f32[1,32], index: 2, kind: input, shape index: {}]   ;;  %s232_s3 = inlined_call_operand.hbm [shape: f32[8,32], index: 3, kind: output, shape index: {}]  }
   0x1   :  { %9 = vsyncpa [#allocation6], 0 }
   0x2   :  { %10 = vsyncpa [#allocation4], 0  ;;  %s16_s14 = sshll.u32 %s229_s0, 4  ;;  %s191_s15 = smov [#allocation2]   ;;  %s17_s14 = int_to_ptr.hbm [resolvable:$true] %s16_s14 }
   0x3   :  { %s18_s16 = sshll.u32 %s191_s15, 4  ;;  %s27_s19 = sshll.u32 %s230_s1, 4  ;;  %s19_s16 = int_to_ptr.vmem [resolvable:$true] %s18_s16  ;;  %s28_s19 = int_to_ptr.hbm [resolvable:$true] %s27_s19 }
   0x4   :  { %21 = dma.hbm_to_vmem [thread:$0]  %s17_s14, 128, %s19_s16, [#allocation3]  }
   0x5   :  { %s192_s20 = smov [#allocation5]  }
   0x6   :  { %s29_s21 = sshll.u32 %s192_s20, 4  ;;  %s30_s21 = int_to_ptr.vmem [resolvable:$true] %s29_s21 }
   0x7   :  { %32 = dma.hbm_to_vmem [thread:$0]  %s28_s19, 16, %s30_s21, [#allocation6]  }
   0x8   :  { %185 = dma.done.wait [#allocation3], 128  }
   0x9   :  { %186 = vsyncadd [#allocation3], 4294967168 }
   0xa   :  { %187 = dma.done.wait [#allocation6], 16  }
   0xb   :  { %188 = vsyncadd [#allocation6], 4294967280  ;;  %vm44_vm0 = vcmask 261120   ;;  %v43_v0 = vld [vmem:[#allocation2] sm:$0xff]  ;;  %v76_v28 = vld [vmem:[#allocation5] sm:$0x1] }
   0xc   :  { %v45_v1 = vsel %vm44_vm0, %v43_v0, 0.0  ;;  %v52_v2 = vmul.f32 %v43_v0, %v43_v0  ;;  %v78_v31 = vld [vmem:[%s231_s2] sm:$0x1]  ;;  %s193_s22 = smov [#allocation7]   ;;  %s97_s26 = sshll.u32 %s232_s3, 4  ;;  %s98_s26 = int_to_ptr.hbm [resolvable:$true] %s97_s26 }
   0xd   :  { %v46_v3 = vrot.slane %v45_v1, 4  ;;  %s95_s23 = sshll.u32 %s193_s22, 4  ;;  %s96_s23 = int_to_ptr.vmem [resolvable:$true] %s95_s23 }
   0xe   :  { %v53_v4 = vsel %vm44_vm0, %v52_v2, 0.0 }
   0xf   :  { %v47_v5 = vadd.f32 %v46_v3, %v45_v1  ;;  %v54_v6 = vrot.slane %v53_v4, 4 }
  0x11   :  { %v48_v7 = vrot.slane %v47_v5, 2  ;;  %v55_v8 = vadd.f32 %v54_v6, %v53_v4 }
  0x13   :  { %v49_v9 = vadd.f32 %v48_v7, %v47_v5  ;;  %v56_v10 = vrot.slane %v55_v8, 2 }
  0x15   :  { %v50_v11 = vrot.slane %v49_v9, 1  ;;  %v57_v12 = vadd.f32 %v56_v10, %v55_v8 }
  0x17   :  { %v51_v13 = vadd.f32 %v50_v11, %v49_v9  ;;  %v58_v14 = vrot.slane %v57_v12, 1 }
  0x19   :  { %v59_v15 = vadd.f32 %v58_v14, %v57_v12  ;;  %v60_v16 = vmul.f32 0.125, %v51_v13 }
  0x1b   :  { %v61_v17 = vmul.f32 0.125, %v59_v15  ;;  %v62_v18 = vmul.f32 %v60_v16, %v60_v16 }
  0x1d   :  { %v63_v19 = vsub.f32 %v61_v17, %v62_v18 }
  0x1f   :  { %v64_v20 = vmax.f32 %v63_v19, 0.0 }
  0x21   :  { %v65_v21 = vadd.f32 1e-05, %v64_v20 }
  0x23   :  { %111 = vrsqrt.f32 %v65_v21  ;;  %vm72_vm1 = vweird.f32 %v65_v21 }
  0x29   :  { %v112_v22 = vpop.eup %111 }
  0x2a   :  { %v67_v23 = vmul.f32 %v112_v22, %v65_v21  ;;  %vm73_vm2 = vweird.f32 %v112_v22 }
  0x2b   :  { %vm74_vm3 = vmor %vm72_vm1, %vm73_vm2 }
  0x2c   :  { %v68_v24 = vmul.f32 %v112_v22, %v67_v23 }
  0x2e   :  { %v69_v25 = vmul.f32 0.5, %v68_v24 }
  0x30   :  { %v70_v26 = vsub.f32 1.5, %v69_v25 }
  0x32   :  { %v71_v27 = vmul.f32 %v112_v22, %v70_v26 }
  0x34   :  { %v75_v29 = vsel %vm74_vm3, %v112_v22, %v71_v27 }
  0x35   :  { %v77_v30 = vmul.f32 %v76_v28, %v75_v29 }
  0x37   :  { %v79_v32 = vmul.f32 %v77_v30, %v60_v16  ;;  %v82_v33 = vperm.slane %v77_v30, 0 }
  0x39   :  { %v80_v34 = vsub.f32 %v78_v31, %v79_v32  ;;  %v84_v35 = vmul.f32 %v82_v33, %v43_v0 }
  0x3b   :  { %v86_v36 = vperm.slane %v80_v34, 0 }
  0x3d   :  { %v88_v37 = vadd.f32 %v86_v36, %v84_v35 }
  0x3f   :  { %89 = vst.msk [vmem:[#allocation7] sm:$0xff] %vm44_vm0, %v88_v37 }
  0x40   :  { %100 = dma.vmem_to_hbm [thread:$0]  %s96_s23, 128, %s98_s26, [#allocation4]  }
  0x41   :  { %189 = dma.done.wait [#allocation4], 128  }
  0x42   :  { %190 = vsyncadd [#allocation4], 4294967168 }
  0x43   :  { %105 = vsyncpa [#allocation3], 1 }
  0x44   :  { %106 = vsyncpa [#allocation6], 1 }
  0x45   :  { %107 = vsyncpa [#allocation4], 1 }

</bundles_post_ra>
